<compile_context>
chip_gen: v6e
topology: v6e:2x2x1
jax: 0.10.0
libtpu: 0.0.40
codegen_flags: <defaults>
</compile_context>

<pallas_src>
import jax
import jax.numpy as jnp
from jax.experimental import pallas as pl
from jax.experimental.pallas import tpu as pltpu


# ~4 MiB per buffer: 4 double-buffered tiles (in + out) -> <= 16 MiB, which we
# cover with an explicit 32 MiB vmem_limit_bytes (safe on v5e/v6e/v7x).
_TILE_BYTE_BUDGET = 4 * 1024 * 1024
_VMEM_LIMIT_BYTES = 32 * 1024 * 1024


def _chomp_copy_kernel(x_ref, o_ref):
    # Both refs are (TR, TL) tiles addressed with the same block indices, so a
    # straight copy implements out[r, c] = in[r, c] for all valid output
    # positions (c < l_out). Out-of-bounds parts of the last tiles are padded
    # on read and masked on write by the Pallas pipeline.
    o_ref[...] = x_ref[...]


def _round_up(v: int, m: int) -> int:
    return ((v + m - 1) // m) * m


def _cdiv(a: int, b: int) -> int:
    return -(-a // b)


def _pick_lane_tile(lanes_total: int, max_tl: int) -> int:
    """Largest lane tile (multiple of 128) <= max_tl; prefer covering the full
    lane extent, else an even divisor of it to minimize over-read waste."""
    if lanes_total <= max_tl:
        return lanes_total
    n_blocks = lanes_total // 128
    max_blocks = max(1, max_tl // 128)
    for cand in range(max_blocks, 0, -1):
        if n_blocks % cand == 0:
            return cand * 128
    return max_blocks * 128


def _choose_tiles(rows: int, l_out: int, itemsize: int, sub_mult: int):
    lanes_total = _round_up(l_out, 128)
    rows_total = _round_up(rows, sub_mult)

    # Lane tile first (review item 1 & 2): allow it to grow far past 1024 when
    # rows are tiny so the per-step tile still hits the byte budget.
    max_tl = max(128, (_TILE_BYTE_BUDGET // (sub_mult * itemsize)) // 128 * 128)
    tl = _pick_lane_tile(lanes_total, max_tl)

    # Row tile second: fill the remaining budget.
    tr = (_TILE_BYTE_BUDGET // (tl * itemsize)) // sub_mult * sub_mult
    tr = max(sub_mult, min(tr, rows_total))

    # v7x megacore: guarantee >= 2 grid steps along a "parallel" axis when the
    # tiles would otherwise collapse the grid to a single step and there is
    # enough work to be worth sharding across two TensorCores.
    total_bytes = rows * l_out * itemsize
    if _cdiv(rows, tr) * _cdiv(l_out, tl) == 1 and total_bytes >= (1 << 20):
        if rows >= 2 * sub_mult:
            tr = _round_up(_cdiv(rows, 2), sub_mult)
        elif l_out >= 256:
            tl = _round_up(_cdiv(l_out, 2), 128)

    return tr, tl


def chomp1d(x: jax.Array, chomp_size: int) -> jax.Array:
    """Pallas equivalent of Chomp1d.forward: x[:, :, :-chomp_size]."""
    assert chomp_size > 0, "chomp_size must be positive (chomp_size=0 is degenerate)"
    n, c, l = x.shape
    l_out = l - chomp_size
    assert l_out > 0, "chomp_size must be smaller than the length dimension"

    rows = n * c
    x2 = x.reshape(rows, l)  # contiguous flatten of (N, C) -> rows

    # Sublane packing multiple depends on dtype width (8 for f32, 16 for bf16,
    # 32 for int8/fp8).
    itemsize = jnp.dtype(x.dtype).itemsize
    sub_mult = max(8, 32 // max(itemsize, 1))

    tr, tl = _choose_tiles(rows, l_out, itemsize, sub_mult)
    grid = (pl.cdiv(rows, tr), pl.cdiv(l_out, tl))

    # Pure memory op: read + write l_out bytes per row (advisory for XLA).
    cost = pl.CostEstimate(
        flops=0,
        transcendentals=0,
        bytes_accessed=2 * rows * l_out * itemsize,
    )

    out2 = pl.pallas_call(
        _chomp_copy_kernel,
        out_shape=jax.ShapeDtypeStruct((rows, l_out), x.dtype),
        grid_spec=pltpu.PrefetchScalarGridSpec(
            num_scalar_prefetch=0,
            grid=grid,
            # Input block indexed over the first l_out columns only: the
            # chomped tail is never read except possibly within the last
            # partial lane tile.
            in_specs=[pl.BlockSpec((tr, tl), lambda i, j: (i, j))],
            out_specs=pl.BlockSpec((tr, tl), lambda i, j: (i, j)),
        ),
        compiler_params=pltpu.CompilerParams(
            dimension_semantics=("parallel", "parallel"),
            vmem_limit_bytes=_VMEM_LIMIT_BYTES,
        ),
        cost_estimate=cost,
    )(x2)

    return out2.reshape(n, c, l_out)


if __name__ == "__main__":
    # Small shapes consistent with a TCN Conv1d activation: (batch, channels, length)
    N, C, L = 2, 4, 16
    CHOMP = 3  # e.g. (kernel_size - 1) * dilation padding being chomped off

    key = jax.random.PRNGKey(0)
    x = jax.random.normal(key, (N, C, L), dtype=jnp.float32)

    out = chomp1d(x, CHOMP)
    out = jax.block_until_ready(out)

    # Reference check against plain JAX slicing (same semantics as PyTorch).
    ref = x[:, :, :-CHOMP]
    assert out.shape == (N, C, L - CHOMP), out.shape
    assert out.dtype == x.dtype
    assert jnp.array_equal(out, ref), "Pallas Chomp1d mismatch vs reference"

    print("KERNEL_OK")
</pallas_src>

<mosaic_0001>
module attributes {stable_mosaic.version = 11 : i64} {
  func.func @_chomp_copy_kernel(%arg0: i32, %arg1: i32, %arg2: memref<8x128xf32, #tpu.memory_space<vmem>>, %arg3: memref<8x128xf32, #tpu.memory_space<vmem>>) attributes {dimension_semantics = [#tpu.dimension_semantics<parallel>, #tpu.dimension_semantics<parallel>], iteration_bounds = array<i64: 1, 1>, scalar_prefetch = 0 : i64, scratch_operands = 0 : i64, tpu.core_type = #tpu.core_type<tc>, window_params = [{transform_indices = @transform_0, window_bounds = array<i64: 8, 128>}, {transform_indices = @transform_1, window_bounds = array<i64: 8, 128>}]} {
    %c0 = arith.constant 0 : index
    %c0_0 = arith.constant 0 : index
    %0 = vector.load %arg2[%c0, %c0_0] : memref<8x128xf32, #tpu.memory_space<vmem>>, vector<8x128xf32>
    %c0_1 = arith.constant 0 : index
    %c0_2 = arith.constant 0 : index
    %1 = vector.load %arg3[%c0_1, %c0_2] : memref<8x128xf32, #tpu.memory_space<vmem>>, vector<8x128xf32>
    tpu.vector_store %arg3[%c0_1, %c0_2], %0 {strides = array<i32>} : memref<8x128xf32, #tpu.memory_space<vmem>>, vector<8x128xf32>,
    return
  }
  func.func @transform_0(%arg0: i32, %arg1: i32) -> (i32, i32) {
    %c0_i32 = arith.constant 0 : i32
    return %arg0, %arg1 : i32, i32
  }
  func.func @transform_1(%arg0: i32, %arg1: i32) -> (i32, i32) {
    %c0_i32 = arith.constant 0 : i32
    return %arg0, %arg1 : i32, i32
  }
}

</mosaic_0001>

<bundles_post_ra>
// kernel: tpu_custom_call.1
= control target key start
LH: loop header
LB: loop body
LE: loop exit
PB: predicated region body
PF: predicated region fallthrough
CT: control target
= control target key end

     0   :  { %6 = vsyncpa [#allocation3], 0  ;;  %s102_s0 = inlined_call_operand.hbm [shape: f32[8,16], index: 0, kind: input, shape index: {}]   ;;  %s103_s1 = inlined_call_operand.hbm [shape: f32[8,13], index: 1, kind: output, shape index: {}]  }
   0x1   :  { %7 = vsyncpa [#allocation4], 0  ;;  %s84_s6 = smov [#allocation2]  }
   0x2   :  { %s14_s7 = sshll.u32 %s84_s6, 4  ;;  %s15_s7 = int_to_ptr.vmem [resolvable:$true] %s14_s7 }
   0x3   :  { %s48_s8 = scalar_lea.vmem %s15_s7, 128  ;;  %p53_p1 = scmp.lt.s32.totalorder %s15_s7, %s15_s7 }
   0x4   :  { %p49_p0 = scmp.ne.s32.totalorder %s15_s7, %s48_s8  ;;  %p54_p2 = scmp.lt.s32.totalorder %s48_s8, %s48_s8 }
   0x6   :  { %p55_p3 = por %p54_p2, %p53_p1 }
   0x8   :  { %p56_p4 = pnand %p55_p3, %p49_p0 }
   0xa   :  { %59 = shalt.err (!%p56_p4)
}
   0xb   :  { %17 = dma.hbm_to_vmem [thread:$0]  %s102_s0, 128, %s15_s7, [#allocation3]  }
   0xc   :  { %80 = dma.done.wait [#allocation3], 128  }
   0xd   :  { %81 = vsyncadd [#allocation3], 4294967168  ;;  %s85_s11 = smov [#allocation5]   ;;  %v21_v0 = vld [vmem:[#allocation2] sm:$0xff] }
   0xe   :  { %s29_s12 = sshll.u32 %s85_s11, 4  ;;  %22 = vst [vmem:[#allocation5] sm:$0xff] %v21_v0  ;;  %s30_s12 = int_to_ptr.vmem [resolvable:$true] %s29_s12 }
   0xf   :  { %s60_s13 = scalar_lea.vmem %s30_s12, 128  ;;  %p65_p6 = scmp.lt.s32.totalorder %s30_s12, %s30_s12 }
  0x10   :  { %p61_p5 = scmp.ne.s32.totalorder %s30_s12, %s60_s13  ;;  %p66_p7 = scmp.lt.s32.totalorder %s60_s13, %s60_s13 }
  0x12   :  { %p67_p8 = por %p66_p7, %p65_p6 }
  0x14   :  { %p68_p9 = pnand %p67_p8, %p61_p5 }
  0x16   :  { %71 = shalt.err (!%p68_p9)
}
  0x17   :  { %32 = dma.vmem_to_hbm [thread:$0]  %s30_s12, 128, %s103_s1, [#allocation4]  }
  0x18   :  { %82 = dma.done.wait [#allocation4], 128  }
  0x19   :  { %83 = vsyncadd [#allocation4], 4294967168 }
  0x1a   :  { %36 = vsyncpa [#allocation3], 1 }
  0x1b   :  { %37 = vsyncpa [#allocation4], 1 }

</bundles_post_ra>
